<compile_context>
chip_gen: v7x
topology: tpu7x:2x2x1
jax: 0.10.0
libtpu: 0.0.40
codegen_flags: <defaults>
</compile_context>

<pallas_src>
import functools

import jax
import jax.numpy as jnp
from jax import lax
from jax.experimental import pallas as pl
from jax.experimental.pallas import tpu as pltpu


def rfaconv_kernel(x_ref, w1_ref, wg_ref, b3_ref, w2_ref,
                   mcat_ref, qh_ref, qw_ref, al_ref, ar_ref, out_ref):
    x = x_ref[0]                                   # (C, HW) f32
    C = x.shape[0]
    inv_c = 1.0 / float(C)

    # --- adaptive avg pools: h_pool | w_pool fused as one matmul with Mcat (HW, S) ---
    pooled = jnp.dot(x, mcat_ref[...],
                     preferred_element_type=jnp.float32)            # (C, S)

    # --- conv_block: 1x1 conv (C -> C//16, no bias) + ReLU ---
    x1pre = jnp.maximum(
        jnp.dot(w1_ref[...], pooled, preferred_element_type=jnp.float32), 0.0)  # (C16, S)

    # --- grouped Conv2d(k=3, pad=1, groups=4) over the concatenated (h+w) axis.
    #     The width dim of its input is 1, so only the middle kernel column is live.
    #     Spatial shifts realized as right-matmuls with the (S,S) shift matrices;
    #     block-diagonal (grouped) channel mixing realized with the dense wg[k]. ---
    left  = jnp.dot(x1pre, al_ref[...], preferred_element_type=jnp.float32)  # x[c, s-1]
    right = jnp.dot(x1pre, ar_ref[...], preferred_element_type=jnp.float32)  # x[c, s+1]
    x1 = (jnp.dot(wg_ref[0], left,  preferred_element_type=jnp.float32)
          + jnp.dot(wg_ref[1], x1pre, preferred_element_type=jnp.float32)
          + jnp.dot(wg_ref[2], right, preferred_element_type=jnp.float32)
          + b3_ref[...])                                                      # (C16, S)

    # --- conv: 1x1 conv (C//16 -> C, no bias) + softmax over the channel axis ---
    logits = jnp.dot(w2_ref[...], x1, preferred_element_type=jnp.float32)     # (C, S)
    m = jnp.max(logits, axis=0, keepdims=True)
    e = jnp.exp(logits - m)
    att = e / jnp.sum(e, axis=0, keepdims=True)                               # (C, S)

    # --- x2 = x_h * x_w^T expanded onto the flattened H*W axis, x3 = mean over channels ---
    eh = jnp.dot(att, qh_ref[...], preferred_element_type=jnp.float32)        # att[c, i(p)]
    ew = jnp.dot(att, qw_ref[...], preferred_element_type=jnp.float32)        # att[c, H + j(p)]
    x3 = jnp.sum(eh * ew, axis=0, keepdims=True) * inv_c                      # (1, HW)

    # --- out = x3 * x ---
    out_ref[0] = x * x3


def _expand_group_conv_weight(g3_w, groups):
    """(C16, C16//groups, 3, 3) grouped conv weight -> dense block-diag (3, C16, C16).

    Only the middle width column (k_w == 1) of the 3x3 kernel ever touches data
    because the conv input has width 1 with padding 1.
    """
    c16, cpg, _, _ = g3_w.shape
    opg = c16 // groups
    w_mid = g3_w[:, :, :, 1]                                  # (C16, cpg, 3)
    wg = jnp.zeros((3, c16, c16), dtype=jnp.float32)
    for g in range(groups):
        o0, i0 = g * opg, g * cpg
        blk = jnp.transpose(w_mid[o0:o0 + opg], (2, 0, 1))    # (3, opg, cpg)
        wg = wg.at[:, o0:o0 + opg, i0:i0 + cpg].set(blk)
    return wg


@functools.partial(jax.jit, static_argnames=("groups",))
def rfaconv(x, w1, g3_w, g3_b, w2, groups=4):
    """x: (B, C, H, W); w1: (C//16, C); g3_w: (C//16, C//16//groups, 3, 3);
    g3_b: (C//16,); w2: (C, C//16). Returns (B, C, H, W)."""
    B, C, H, W = x.shape
    C16 = w1.shape[0]
    S, HW = H + W, H * W

    x2d = x.reshape(B, C, HW)                                  # free, row-major

    # parameters in kernel-friendly form
    wg = _expand_group_conv_weight(g3_w, groups)               # (3, C16, C16)
    b3 = g3_b.reshape(C16, 1).astype(jnp.float32)

    # structural matrices (built once, VMEM-resident across the batch grid)
    p = jnp.arange(HW)
    i_idx = p // W                                             # row index of flat pos p
    j_idx = p % W                                              # col index of flat pos p
    s = jnp.arange(S)
    mcat = ((i_idx[:, None] == s[None, :]).astype(jnp.float32) / W
            + ((j_idx[:, None] + H) == s[None, :]).astype(jnp.float32) / H)   # (HW, S)
    qh = (s[:, None] == i_idx[None, :]).astype(jnp.float32)                   # (S, HW)
    qw = (s[:, None] == (j_idx[None, :] + H)).astype(jnp.float32)             # (S, HW)
    a_l = jnp.eye(S, k=1, dtype=jnp.float32)    # (x @ a_l)[c, s] = x[c, s-1] (zero pad)
    a_r = jnp.eye(S, k=-1, dtype=jnp.float32)   # (x @ a_r)[c, s] = x[c, s+1] (zero pad)

    def resident(shape):
        return pl.BlockSpec(shape, lambda b, _n=len(shape): (0,) * _n)

    out2d = pl.pallas_call(
        rfaconv_kernel,
        out_shape=jax.ShapeDtypeStruct((B, C, HW), jnp.float32),
        grid=(B,),
        in_specs=[
            pl.BlockSpec((1, C, HW), lambda b: (b, 0, 0)),     # x, streamed per batch
            resident((C16, C)),                                # conv_block 1x1 weight
            resident((3, C16, C16)),                           # grouped conv (dense)
            resident((C16, 1)),                                # grouped conv bias
            resident((C, C16)),                                # conv 1x1 weight
            resident((HW, S)),                                 # pooling matrix
            resident((S, HW)),                                 # row-expansion
            resident((S, HW)),                                 # col-expansion
            resident((S, S)),                                  # shift left
            resident((S, S)),                                  # shift right
        ],
        out_specs=pl.BlockSpec((1, C, HW), lambda b: (b, 0, 0)),
        compiler_params=pltpu.CompilerParams(
            dimension_semantics=("parallel",),
            vmem_limit_bytes=32 * 1024 * 1024,
        ),
    )(x2d, w1.astype(jnp.float32), wg, b3, w2.astype(jnp.float32),
      mcat, qh, qw, a_l, a_r)

    return out2d.reshape(B, C, H, W)


def rfaconv_reference(x, w1, g3_w, g3_b, w2, groups=4):
    """Pure-JAX mirror of the PyTorch forward."""
    B, C, H, W = x.shape
    ph = jnp.mean(x, axis=3)                                    # h_pool -> (B, C, H)
    pw = jnp.mean(x, axis=2)                                    # w_pool -> (B, C, W)
    xh = jax.nn.relu(jnp.einsum('oc,bch->boh', w1, ph))         # (B, C16, H)
    xw = jax.nn.relu(jnp.einsum('oc,bcw->bow', w1, pw))         # (B, C16, W)
    xc = jnp.concatenate([xh, xw], axis=2)[..., None]           # (B, C16, H+W, 1)
    x1 = lax.conv_general_dilated(
        xc, g3_w, window_strides=(1, 1), padding=((1, 1), (1, 1)),
        dimension_numbers=('NCHW', 'OIHW', 'NCHW'),
        feature_group_count=groups) + g3_b[None, :, None, None]
    x1 = x1[..., 0]                                             # (B, C16, H+W)
    x1h, x1w = x1[:, :, :H], x1[:, :, H:]
    zh = jax.nn.softmax(jnp.einsum('oc,bch->boh', w2, x1h), axis=1)   # (B, C, H)
    zw = jax.nn.softmax(jnp.einsum('oc,bcw->bow', w2, x1w), axis=1)   # (B, C, W)
    x2 = zh[:, :, :, None] * zw[:, :, None, :]                  # (B, C, H, W)
    x3 = jnp.mean(x2, axis=1, keepdims=True)                    # (B, 1, H, W)
    return x3 * x


if __name__ == "__main__":
    B, C, H, W = 2, 64, 16, 16        # in_dim=64 -> in_dim//16=4, grouped conv groups=4
    C16 = C // 16
    GROUPS = 4

    key = jax.random.PRNGKey(0)
    kx, k1, kg, kb, k2 = jax.random.split(key, 5)

    x = jax.random.normal(kx, (B, C, H, W), dtype=jnp.float32)

    bound1 = 1.0 / (C ** 0.5)
    w1 = jax.random.uniform(k1, (C16, C), minval=-bound1, maxval=bound1,
                            dtype=jnp.float32)                       # conv_block 1x1 (no bias)
    g3_w = jax.random.uniform(kg, (C16, C16 // GROUPS, 3, 3),
                              minval=-0.3, maxval=0.3, dtype=jnp.float32)  # grouped 3x3 conv
    g3_b = jax.random.uniform(kb, (C16,), minval=-0.3, maxval=0.3,
                              dtype=jnp.float32)                     # grouped conv bias
    bound2 = 1.0 / (C16 ** 0.5)
    w2 = jax.random.uniform(k2, (C, C16), minval=-bound2, maxval=bound2,
                            dtype=jnp.float32)                       # conv 1x1 (no bias)

    out = rfaconv(x, w1, g3_w, g3_b, w2, groups=GROUPS)
    jax.block_until_ready(out)

    ref = rfaconv_reference(x, w1, g3_w, g3_b, w2, groups=GROUPS)
    assert out.shape == (B, C, H, W)
    max_err = float(jnp.max(jnp.abs(out - ref)))
    assert jnp.allclose(out, ref, atol=1e-5, rtol=1e-5), f"max_err={max_err}"

    print("KERNEL_OK")
</pallas_src>

<mosaic_0001>
module attributes {stable_mosaic.version = 11 : i64} {
  func.func @rfaconv_kernel(%arg0: i32, %arg1: memref<1x64x256xf32, #tpu.memory_space<vmem>>, %arg2: memref<4x64xf32, #tpu.memory_space<vmem>>, %arg3: memref<3x4x4xf32, #tpu.memory_space<vmem>>, %arg4: memref<4x1xf32, #tpu.memory_space<vmem>>, %arg5: memref<64x4xf32, #tpu.memory_space<vmem>>, %arg6: memref<256x32xf32, #tpu.memory_space<vmem>>, %arg7: memref<32x256xf32, #tpu.memory_space<vmem>>, %arg8: memref<32x256xf32, #tpu.memory_space<vmem>>, %arg9: memref<32x32xf32, #tpu.memory_space<vmem>>, %arg10: memref<32x32xf32, #tpu.memory_space<vmem>>, %arg11: memref<1x64x256xf32, #tpu.memory_space<vmem>>) attributes {dimension_semantics = [#tpu.dimension_semantics<parallel>], iteration_bounds = array<i64: 2>, scalar_prefetch = 0 : i64, scratch_operands = 0 : i64, tpu.core_type = #tpu.core_type<tc>, window_params = [{transform_indices = @transform_0, window_bounds = array<i64: 1, 64, 256>}, {pipeline_mode = #tpu.pipeline_mode<synchronous>, transform_indices = @transform_1, window_bounds = array<i64: 4, 64>}, {pipeline_mode = #tpu.pipeline_mode<synchronous>, transform_indices = @transform_2, window_bounds = array<i64: 3, 4, 4>}, {pipeline_mode = #tpu.pipeline_mode<synchronous>, transform_indices = @transform_3, window_bounds = array<i64: 4, 1>}, {pipeline_mode = #tpu.pipeline_mode<synchronous>, transform_indices = @transform_4, window_bounds = array<i64: 64, 4>}, {pipeline_mode = #tpu.pipeline_mode<synchronous>, transform_indices = @transform_5, window_bounds = array<i64: 256, 32>}, {pipeline_mode = #tpu.pipeline_mode<synchronous>, transform_indices = @transform_6, window_bounds = array<i64: 32, 256>}, {pipeline_mode = #tpu.pipeline_mode<synchronous>, transform_indices = @transform_7, window_bounds = array<i64: 32, 256>}, {pipeline_mode = #tpu.pipeline_mode<synchronous>, transform_indices = @transform_8, window_bounds = array<i64: 32, 32>}, {pipeline_mode = #tpu.pipeline_mode<synchronous>, transform_indices = @transform_9, window_bounds = array<i64: 32, 32>}, {transform_indices = @transform_10, window_bounds = array<i64: 1, 64, 256>}]} {
    %c0 = arith.constant 0 : index
    %c0_0 = arith.constant 0 : index
    %c0_1 = arith.constant 0 : index
    %0 = vector.load %arg1[%c0, %c0_0, %c0_1] : memref<1x64x256xf32, #tpu.memory_space<vmem>>, vector<1x64x256xf32>
    %1 = vector.shape_cast %0 : vector<1x64x256xf32> to vector<64x256xf32>
    %c0_2 = arith.constant 0 : index
    %c0_3 = arith.constant 0 : index
    %2 = vector.load %arg6[%c0_2, %c0_3] : memref<256x32xf32, #tpu.memory_space<vmem>>, vector<256x32xf32>
    %cst = arith.constant dense<0.000000e+00> : vector<64x32xf32>
    %3 = tpu.matmul %1, %2, %cst {dimension_numbers = #tpu.dot_dimension_numbers<[1], [0], [0], [1], [0, 0, 1, 1], [], []>} : vector<64x256xf32>, vector<256x32xf32>, vector<64x32xf32> -> vector<64x32xf32>
    %c0_4 = arith.constant 0 : index
    %c0_5 = arith.constant 0 : index
    %4 = vector.load %arg2[%c0_4, %c0_5] : memref<4x64xf32, #tpu.memory_space<vmem>>, vector<4x64xf32>
    %cst_6 = arith.constant dense<0.000000e+00> : vector<4x32xf32>
    %5 = tpu.matmul %4, %3, %cst_6 {dimension_numbers = #tpu.dot_dimension_numbers<[1], [0], [0], [1], [0, 0, 1, 1], [], []>} : vector<4x64xf32>, vector<64x32xf32>, vector<4x32xf32> -> vector<4x32xf32>
    %cst_7 = arith.constant 0.000000e+00 : f32
    %6 = vector.broadcast %cst_7 : f32 to vector<4x32xf32>
    %7 = arith.maximumf %5, %6 : vector<4x32xf32>
    %c0_8 = arith.constant 0 : index
    %c0_9 = arith.constant 0 : index
    %8 = vector.load %arg9[%c0_8, %c0_9] : memref<32x32xf32, #tpu.memory_space<vmem>>, vector<32x32xf32>
    %cst_10 = arith.constant dense<0.000000e+00> : vector<4x32xf32>
    %9 = tpu.matmul %7, %8, %cst_10 {dimension_numbers = #tpu.dot_dimension_numbers<[1], [0], [0], [1], [0, 0, 1, 1], [], []>} : vector<4x32xf32>, vector<32x32xf32>, vector<4x32xf32> -> vector<4x32xf32>
    %c0_11 = arith.constant 0 : index
    %c0_12 = arith.constant 0 : index
    %10 = vector.load %arg10[%c0_11, %c0_12] : memref<32x32xf32, #tpu.memory_space<vmem>>, vector<32x32xf32>
    %cst_13 = arith.constant dense<0.000000e+00> : vector<4x32xf32>
    %11 = tpu.matmul %7, %10, %cst_13 {dimension_numbers = #tpu.dot_dimension_numbers<[1], [0], [0], [1], [0, 0, 1, 1], [], []>} : vector<4x32xf32>, vector<32x32xf32>, vector<4x32xf32> -> vector<4x32xf32>
    %c0_14 = arith.constant 0 : index
    %c0_15 = arith.constant 0 : index
    %c0_16 = arith.constant 0 : index
    %12 = vector.load %arg3[%c0_14, %c0_15, %c0_16] : memref<3x4x4xf32, #tpu.memory_space<vmem>>, vector<1x4x4xf32>
    %13 = vector.shape_cast %12 : vector<1x4x4xf32> to vector<4x4xf32>
    %cst_17 = arith.constant dense<0.000000e+00> : vector<4x32xf32>
    %14 = tpu.matmul %13, %9, %cst_17 {dimension_numbers = #tpu.dot_dimension_numbers<[1], [0], [0], [1], [0, 0, 1, 1], [], []>} : vector<4x4xf32>, vector<4x32xf32>, vector<4x32xf32> -> vector<4x32xf32>
    %c1 = arith.constant 1 : index
    %c0_18 = arith.constant 0 : index
    %c0_19 = arith.constant 0 : index
    %15 = vector.load %arg3[%c1, %c0_18, %c0_19] : memref<3x4x4xf32, #tpu.memory_space<vmem>>, vector<1x4x4xf32>
    %16 = vector.shape_cast %15 : vector<1x4x4xf32> to vector<4x4xf32>
    %cst_20 = arith.constant dense<0.000000e+00> : vector<4x32xf32>
    %17 = tpu.matmul %16, %7, %cst_20 {dimension_numbers = #tpu.dot_dimension_numbers<[1], [0], [0], [1], [0, 0, 1, 1], [], []>} : vector<4x4xf32>, vector<4x32xf32>, vector<4x32xf32> -> vector<4x32xf32>
    %18 = arith.addf %14, %17 : vector<4x32xf32>
    %c2 = arith.constant 2 : index
    %c0_21 = arith.constant 0 : index
    %c0_22 = arith.constant 0 : index
    %19 = vector.load %arg3[%c2, %c0_21, %c0_22] : memref<3x4x4xf32, #tpu.memory_space<vmem>>, vector<1x4x4xf32>
    %20 = vector.shape_cast %19 : vector<1x4x4xf32> to vector<4x4xf32>
    %cst_23 = arith.constant dense<0.000000e+00> : vector<4x32xf32>
    %21 = tpu.matmul %20, %11, %cst_23 {dimension_numbers = #tpu.dot_dimension_numbers<[1], [0], [0], [1], [0, 0, 1, 1], [], []>} : vector<4x4xf32>, vector<4x32xf32>, vector<4x32xf32> -> vector<4x32xf32>
    %22 = arith.addf %18, %21 : vector<4x32xf32>
    %c0_24 = arith.constant 0 : index
    %c0_25 = arith.constant 0 : index
    %23 = vector.load %arg4[%c0_24, %c0_25] : memref<4x1xf32, #tpu.memory_space<vmem>>, vector<4x1xf32>
    %24 = vector.broadcast %23 : vector<4x1xf32> to vector<4x32xf32>
    %25 = arith.addf %22, %24 : vector<4x32xf32>
    %c0_26 = arith.constant 0 : index
    %c0_27 = arith.constant 0 : index
    %26 = vector.load %arg5[%c0_26, %c0_27] : memref<64x4xf32, #tpu.memory_space<vmem>>, vector<64x4xf32>
    %cst_28 = arith.constant dense<0.000000e+00> : vector<64x32xf32>
    %27 = tpu.matmul %26, %25, %cst_28 {dimension_numbers = #tpu.dot_dimension_numbers<[1], [0], [0], [1], [0, 0, 1, 1], [], []>} : vector<64x4xf32>, vector<4x32xf32>, vector<64x32xf32> -> vector<64x32xf32>
    %cst_29 = arith.constant dense<0xFF800000> : vector<32xf32>
    %28 = vector.multi_reduction <maximumf>, %27, %cst_29 [0] : vector<64x32xf32> to vector<32xf32>
    %29 = vector.shape_cast %28 : vector<32xf32> to vector<1x32xf32>
    %30 = vector.broadcast %29 : vector<1x32xf32> to vector<64x32xf32>
    %31 = arith.subf %27, %30 : vector<64x32xf32>
    %32 = math.exp %31 : vector<64x32xf32>
    %cst_30 = arith.constant dense<0.000000e+00> : vector<32xf32>
    %33 = vector.multi_reduction <add>, %32, %cst_30 [0] : vector<64x32xf32> to vector<32xf32>
    %34 = vector.shape_cast %33 : vector<32xf32> to vector<1x32xf32>
    %35 = vector.broadcast %34 : vector<1x32xf32> to vector<64x32xf32>
    %36 = arith.divf %32, %35 : vector<64x32xf32>
    %c0_31 = arith.constant 0 : index
    %c0_32 = arith.constant 0 : index
    %37 = vector.load %arg7[%c0_31, %c0_32] : memref<32x256xf32, #tpu.memory_space<vmem>>, vector<32x256xf32>
    %cst_33 = arith.constant dense<0.000000e+00> : vector<64x256xf32>
    %38 = tpu.matmul %36, %37, %cst_33 {dimension_numbers = #tpu.dot_dimension_numbers<[1], [0], [0], [1], [0, 0, 1, 1], [], []>} : vector<64x32xf32>, vector<32x256xf32>, vector<64x256xf32> -> vector<64x256xf32>
    %c0_34 = arith.constant 0 : index
    %c0_35 = arith.constant 0 : index
    %39 = vector.load %arg8[%c0_34, %c0_35] : memref<32x256xf32, #tpu.memory_space<vmem>>, vector<32x256xf32>
    %cst_36 = arith.constant dense<0.000000e+00> : vector<64x256xf32>
    %40 = tpu.matmul %36, %39, %cst_36 {dimension_numbers = #tpu.dot_dimension_numbers<[1], [0], [0], [1], [0, 0, 1, 1], [], []>} : vector<64x32xf32>, vector<32x256xf32>, vector<64x256xf32> -> vector<64x256xf32>
    %41 = arith.mulf %38, %40 : vector<64x256xf32>
    %cst_37 = arith.constant dense<0.000000e+00> : vector<256xf32>
    %42 = vector.multi_reduction <add>, %41, %cst_37 [0] : vector<64x256xf32> to vector<256xf32>
    %43 = vector.shape_cast %42 : vector<256xf32> to vector<1x256xf32>
    %cst_38 = arith.constant 1.562500e-02 : f32
    %44 = vector.broadcast %cst_38 : f32 to vector<1x256xf32>
    %45 = arith.mulf %43, %44 : vector<1x256xf32>
    %46 = vector.broadcast %45 : vector<1x256xf32> to vector<64x256xf32>
    %47 = arith.mulf %1, %46 : vector<64x256xf32>
    %c0_39 = arith.constant 0 : index
    %c0_40 = arith.constant 0 : index
    %c0_41 = arith.constant 0 : index
    %48 = vector.load %arg11[%c0_39, %c0_40, %c0_41] : memref<1x64x256xf32, #tpu.memory_space<vmem>>, vector<1x64x256xf32>
    %49 = vector.shape_cast %48 : vector<1x64x256xf32> to vector<64x256xf32>
    %50 = vector.shape_cast %47 : vector<64x256xf32> to vector<1x64x256xf32>
    tpu.vector_store %arg11[%c0_39, %c0_40, %c0_41], %50 {strides = array<i32>} : memref<1x64x256xf32, #tpu.memory_space<vmem>>, vector<1x64x256xf32>,
    return
  }
  func.func @transform_0(%arg0: i32) -> (i32, i32, i32) {
    %c0_i32 = arith.constant 0 : i32
    %c0_i32_0 = arith.constant 0 : i32
    %c0_i32_1 = arith.constant 0 : i32
    return %arg0, %c0_i32, %c0_i32_0 : i32, i32, i32
  }
  func.func @transform_1(%arg0: i32) -> (i32, i32) {
    %c0_i32 = arith.constant 0 : i32
    %c0_i32_0 = arith.constant 0 : i32
    %c0_i32_1 = arith.constant 0 : i32
    return %c0_i32, %c0_i32_0 : i32, i32
  }
  func.func @transform_2(%arg0: i32) -> (i32, i32, i32) {
    %c0_i32 = arith.constant 0 : i32
    %c0_i32_0 = arith.constant 0 : i32
    %c0_i32_1 = arith.constant 0 : i32
    %c0_i32_2 = arith.constant 0 : i32
    return %c0_i32, %c0_i32_0, %c0_i32_1 : i32, i32, i32
  }
  func.func @transform_3(%arg0: i32) -> (i32, i32) {
    %c0_i32 = arith.constant 0 : i32
    %c0_i32_0 = arith.constant 0 : i32
    %c0_i32_1 = arith.constant 0 : i32
    return %c0_i32, %c0_i32_0 : i32, i32
  }
  func.func @transform_4(%arg0: i32) -> (i32, i32) {
    %c0_i32 = arith.constant 0 : i32
    %c0_i32_0 = arith.constant 0 : i32
    %c0_i32_1 = arith.constant 0 : i32
    return %c0_i32, %c0_i32_0 : i32, i32
  }
  func.func @transform_5(%arg0: i32) -> (i32, i32) {
    %c0_i32 = arith.constant 0 : i32
    %c0_i32_0 = arith.constant 0 : i32
    %c0_i32_1 = arith.constant 0 : i32
    return %c0_i32, %c0_i32_0 : i32, i32
  }
  func.func @transform_6(%arg0: i32) -> (i32, i32) {
    %c0_i32 = arith.constant 0 : i32
    %c0_i32_0 = arith.constant 0 : i32
    %c0_i32_1 = arith.constant 0 : i32
    return %c0_i32, %c0_i32_0 : i32, i32
  }
  func.func @transform_7(%arg0: i32) -> (i32, i32) {
    %c0_i32 = arith.constant 0 : i32
    %c0_i32_0 = arith.constant 0 : i32
    %c0_i32_1 = arith.constant 0 : i32
    return %c0_i32, %c0_i32_0 : i32, i32
  }
  func.func @transform_8(%arg0: i32) -> (i32, i32) {
    %c0_i32 = arith.constant 0 : i32
    %c0_i32_0 = arith.constant 0 : i32
    %c0_i32_1 = arith.constant 0 : i32
    return %c0_i32, %c0_i32_0 : i32, i32
  }
  func.func @transform_9(%arg0: i32) -> (i32, i32) {
    %c0_i32 = arith.constant 0 : i32
    %c0_i32_0 = arith.constant 0 : i32
    %c0_i32_1 = arith.constant 0 : i32
    return %c0_i32, %c0_i32_0 : i32, i32
  }
  func.func @transform_10(%arg0: i32) -> (i32, i32, i32) {
    %c0_i32 = arith.constant 0 : i32
    %c0_i32_0 = arith.constant 0 : i32
    %c0_i32_1 = arith.constant 0 : i32
    return %arg0, %c0_i32, %c0_i32_0 : i32, i32, i32
  }
}

</mosaic_0001>

<bundles_post_ra>
// kernel: rfaconv.1
= control target key start
LH: loop header
LB: loop body
LE: loop exit
PB: predicated region body
PF: predicated region fallthrough
CT: control target
= control target key end

     0   :  { %s1974_s13 = smov 0   ;;  %s2394_s0 = inlined_call_operand.vmem [shape: f32[2,64,256], index: 0, kind: input, shape index: {}]   ;;  %s2395_s1 = inlined_call_operand.vmem [shape: f32[4,64], index: 1, kind: input, shape index: {}]   ;;  %s2396_s2 = inlined_call_operand.vmem [shape: f32[3,4,4], index: 2, kind: input, shape index: {}]   ;;  %s2397_s3 = inlined_call_operand.vmem [shape: f32[4,1], index: 3, kind: input, shape index: {}]   ;;  %s2398_s4 = inlined_call_operand.vmem [shape: f32[64,4], index: 4, kind: input, shape index: {}]   ;;  %s2399_s5 = inlined_call_operand.vmem [shape: f32[256,32], index: 5, kind: input, shape index: {}]   ;;  %s2400_s6 = inlined_call_operand.vmem [shape: f32[32,256], index: 6, kind: input, shape index: {}]   ;;  %s2401_s7 = inlined_call_operand.vmem [shape: f32[32,256], index: 7, kind: input, shape index: {}]   ;;  %s2402_s8 = inlined_call_operand.vmem [shape: f32[32,32], index: 8, kind: input, shape index: {}]   ;;  %s2403_s9 = inlined_call_operand.vmem [shape: f32[32,32], index: 9, kind: input, shape index: {}]   ;;  %s2404_s10 = inlined_call_operand.vmem [shape: f32[2,64,256], index: 10, kind: output, shape index: {}]  }
   0x1 LB: > { %s1595_s14 = sadd.s32 4294967295, %s1913_s13   ;;  %p1599_p0 = scmp.ge.s32.totalorder %s1913_s13, 1  ;;  %s1913_s13 = sphi %s1974_s13, %s20_s13  }
   0x2   : > { %p312_p1 = scmp.lt.s32.totalorder %s1913_s13, 3 }
   0x4   : > { %p313_p2 = pnand %p1599_p0, %p312_p1 }
   0x5   : > { %v392_v0 = vld [vmem:[%s2399_s5 + $0x80] sm:$0xff] (!%p313_p2)  ;;  %v393_v1 = vld [vmem:[%s2399_s5 + $0x88] sm:$0xff] (!%p313_p2)  ;;  %p350_p3 = scmp.lt.s32.totalorder (!%p313_p2), %s1595_s14, 1  ;;  %v394_v5 = vld [vmem:[%s2399_s5 + $0x90] sm:$0xff] (!%p313_p2)  ;;  %vm1916_vm0 = vmmov (!%p313_p2), 0   ;;  %vm514_vm1 = vcmask (!%p313_p2), 523264  }
   0x6   : > { %316 = sbr.rel (%p313_p2) target bundleno = 1509 (0x5e5), region = 60  ;;  %v376_v2 = vld [vmem:[%s2399_s5] sm:$0xff] (!%p313_p2)  ;;  %v1804_v3 = vpack.c.bf16 (!%p313_p2), %v393_v1, %v392_v0  ;;  %v377_v4 = vld [vmem:[%s2399_s5 + $0x8] sm:$0xff] (!%p313_p2)  ;;  %v395_v6 = vld [vmem:[%s2399_s5 + $0x98] sm:$0xff] (!%p313_p2)  ;;  %v1915_v0 = vmov (!%p313_p2), 0.0|0.0   ;;  %v1917_v1 = vmov (!%p313_p2), 0.0  }
   0x7   : > { %v1806_v7 = vpack.c.bf16 (!%p313_p2), %v377_v4, %v376_v2  ;;  %v1808_v8 = vpack.c.bf16 (!%p313_p2), %v395_v6, %v394_v5  ;;  %v378_v9 = vld [vmem:[%s2399_s5 + $0x10] sm:$0xff] (!%p313_p2)  ;;  %v379_v10 = vld [vmem:[%s2399_s5 + $0x18] sm:$0xff] (!%p313_p2)  ;;  %v396_v11 = vld [vmem:[%s2399_s5 + $0xa0] sm:$0xff] (!%p313_p2)  ;;  %1836 = vmatprep.subr.bf16.mxu1 (!%p313_p2), %v1915_v0  ;;  %1750 = vmatprep.mubr.msk.f32.mxu1 (!%p313_p2), %vm1916_vm0, %v1917_v1  ;;  %vm593_vm2 = vcmask (!%p313_p2), 261120   ;;  %vm748_vm3 = vcmask (!%p313_p2), 1043456  }
   0x8   : > { %1805 = vmatprep.subr.bf16.mxu0 (!%p313_p2), %v1804_v3  ;;  %v397_v12 = vld [vmem:[%s2399_s5 + $0xa8] sm:$0xff] (!%p313_p2)  ;;  %v1810_v13 = vpack.c.bf16 (!%p313_p2), %v379_v10, %v378_v9  ;;  %v380_v15 = vld [vmem:[%s2399_s5 + $0x20] sm:$0xff] (!%p313_p2)  ;;  %v398_v17 = vld [vmem:[%s2399_s5 + $0xb0] sm:$0xff] (!%p313_p2)  ;;  %vm744_vm4 = vcmask (!%p313_p2), 31744  }
   0x9   : > { %1807 = vmatpush3.bf16.msra.mxu0 (!%p313_p2), %v1806_v7  ;;  %v1812_v14 = vpack.c.bf16 (!%p313_p2), %v397_v12, %v396_v11  ;;  %v381_v16 = vld [vmem:[%s2399_s5 + $0x28] sm:$0xff] (!%p313_p2)  ;;  %v399_v18 = vld [vmem:[%s2399_s5 + $0xb8] sm:$0xff] (!%p313_p2)  ;;  %v382_v21 = vld [vmem:[%s2399_s5 + $0x30] sm:$0xff] (!%p313_p2) }
   0xa   : > { %1809 = vmatprep.subr.bf16.mxu0 (!%p313_p2), %v1808_v8  ;;  %v1814_v19 = vpack.c.bf16 (!%p313_p2), %v381_v16, %v380_v15  ;;  %v1816_v20 = vpack.c.bf16 (!%p313_p2), %v399_v18, %v398_v17  ;;  %v383_v22 = vld [vmem:[%s2399_s5 + $0x38] sm:$0xff] (!%p313_p2)  ;;  %v400_v23 = vld [vmem:[%s2399_s5 + $0xc0] sm:$0xff] (!%p313_p2)  ;;  %v401_v24 = vld [vmem:[%s2399_s5 + $0xc8] sm:$0xff] (!%p313_p2) }
   0xb   : > { %v1818_v26 = vpack.c.bf16 (!%p313_p2), %v383_v22, %v382_v21  ;;  %v1820_v27 = vpack.c.bf16 (!%p313_p2), %v401_v24, %v400_v23  ;;  %v384_v28 = vld [vmem:[%s2399_s5 + $0x40] sm:$0xff] (!%p313_p2)  ;;  %v385_v29 = vld [vmem:[%s2399_s5 + $0x48] sm:$0xff] (!%p313_p2)  ;;  %v402_v30 = vld [vmem:[%s2399_s5 + $0xd0] sm:$0xff] (!%p313_p2) }
   0xc   : > { %v403_v31 = vld [vmem:[%s2399_s5 + $0xd8] sm:$0xff] (!%p313_p2)  ;;  %v1822_v32 = vpack.c.bf16 (!%p313_p2), %v385_v29, %v384_v28  ;;  %v386_v34 = vld [vmem:[%s2399_s5 + $0x50] sm:$0xff] (!%p313_p2)  ;;  %v404_v36 = vld [vmem:[%s2399_s5 + $0xe0] sm:$0xff] (!%p313_p2) }
   0xd   : > { %s2406_s14 = smov (!%p350_p3, %s1595_s14), 1  ;;  %1811 = vmatpush3.bf16.msra.mxu0 %v1810_v13  ;;  %v1824_v33 = vpack.c.bf16 %v403_v31, %v402_v30  ;;  %v387_v35 = vld [vmem:[%s2399_s5 + $0x58] sm:$0xff]  ;;  %v405_v37 = vld [vmem:[%s2399_s5 + $0xe8] sm:$0xff]  ;;  %v388_v40 = vld [vmem:[%s2399_s5 + $0x60] sm:$0xff] }
   0xe   : > { %s1642_s17 = sshll.u32 %s2406_s14, 7  ;;  %1813 = vmatprep.subr.bf16.mxu0 %v1812_v14  ;;  %v1826_v38 = vpack.c.bf16 %v387_v35, %v386_v34  ;;  %v1828_v39 = vpack.c.bf16 %v405_v37, %v404_v36  ;;  %v389_v41 = vld [vmem:[%s2399_s5 + $0x68] sm:$0xff]  ;;  %v406_v42 = vld [vmem:[%s2399_s5 + $0xf0] sm:$0xff]  ;;  %v407_v43 = vld [vmem:[%s2399_s5 + $0xf8] sm:$0xff] }
   0xf   : > { %s2032_s28 = scalar_lea.vmem %s2394_s0, %s1642_s17  ;;  %v1830_v44 = vpack.c.bf16 %v389_v41, %v388_v40  ;;  %v1832_v45 = vpack.c.bf16 %v407_v43, %v406_v42  ;;  %v390_v46 = vld [vmem:[%s2399_s5 + $0x70] sm:$0xff]  ;;  %v391_v47 = vld [vmem:[%s2399_s5 + $0x78] sm:$0xff]  ;;  %v589_v30 = vld [vmem:[%s2402_s8] sm:$0xff]  ;;  %s2357_s23 = scalar_lea.vmem %s2404_s10, %s1642_s17 }
  0x10   : > { %v2047_v25 = vld [vmem:[%s2032_s28 + $0x8] sm:$0xff]  ;;  %v1834_v48 = vpack.c.bf16 %v391_v47, %v390_v46  ;;  %v2093_v49 = vld [vmem:[%s2032_s28] sm:$0xff]  ;;  %v2096_v50 = vld [vmem:[%s2032_s28 + $0x18] sm:$0xff] }
  0x11   : > { %472 = vmatprep.mubr.f32.mxu0 %v2047_v25  ;;  %1815 = vmatpush3.bf16.msra.mxu0 %v1814_v19  ;;  %v2101_v51 = vld [vmem:[%s2032_s28 + $0x10] sm:$0xff]  ;;  %v2104_v52 = vld [vmem:[%s2032_s28 + $0x28] sm:$0xff]  ;;  %v2109_v53 = vld [vmem:[%s2032_s28 + $0x20] sm:$0xff] }
  0x12   : > { %1817 = vmatprep.subr.bf16.mxu0 %v1816_v20  ;;  %v2112_v54 = vld [vmem:[%s2032_s28 + $0x38] sm:$0xff]  ;;  %v2117_v55 = vld [vmem:[%s2032_s28 + $0x30] sm:$0xff]  ;;  %v2120_v56 = vld [vmem:[%s2032_s28 + $0x48] sm:$0xff] }
  0x13   : > { %v2125_v57 = vld [vmem:[%s2032_s28 + $0x40] sm:$0xff]  ;;  %v2128_v58 = vld [vmem:[%s2032_s28 + $0x58] sm:$0xff]  ;;  %v2133_v59 = vld [vmem:[%s2032_s28 + $0x50] sm:$0xff] }
  0x14   : > { %v2136_v60 = vld [vmem:[%s2032_s28 + $0x68] sm:$0xff]  ;;  %v2141_v61 = vld [vmem:[%s2032_s28 + $0x60] sm:$0xff]  ;;  %v2144_v62 = vld [vmem:[%s2032_s28 + $0x78] sm:$0xff] }
  0x15   : > { %1819 = vmatpush3.bf16.msra.mxu0 %v1818_v26  ;;  %v2149_v63 = vld [vmem:[%s2032_s28 + $0x70] sm:$0xff]  ;;  %v590_v31 = vld [vmem:[%s2402_s8 + $0x8] sm:$0xff]  ;;  %v592_v36 = vld [vmem:[%s2402_s8 + $0x18] sm:$0xff] }
  0x16   : > { %1821 = vmatprep.subr.bf16.mxu0 %v1820_v27  ;;  %v1849_v34 = vpack.c.bf16 %v590_v31, %v589_v30  ;;  %v591_v35 = vld [vmem:[%s2402_s8 + $0x10] sm:$0xff]  ;;  %v1607_v47 = vld [vmem:[%s2396_s2 + $0x4] sm:$0xf] }
  0x17   : > { %v1852_v37 = vpack.c.bf16 %v592_v36, %v591_v35  ;;  %v1200_v31 = vld [vmem:[%s2400_s6 + $0x10] sm:$0xff]  ;;  %v1344_v36 = vld [vmem:[%s2401_s7 + $0x8] sm:$0xff] }
  0x19   : > { %1823 = vmatpush3.bf16.msra.mxu0 %v1822_v32 }
  0x1a   : > { %1825 = vmatprep.subr.bf16.mxu0 %v1824_v33  ;;  %v513_v33 = vld [vmem:[%s2395_s1] sm:$0xf] }
  0x1d   : > { %1827 = vmatpush3.bf16.msra.mxu0 %v1826_v38  ;;  %v667_v38 = vld [vmem:[%s2403_s9] sm:$0xff] }
  0x1e   : > { %1829 = vmatprep.subr.bf16.mxu0 %v1828_v39  ;;  %v668_v39 = vld [vmem:[%s2403_s9 + $0x8] sm:$0xff] }
  0x1f   : > { %v1855_v41 = vpack.c.bf16 %v668_v39, %v667_v38  ;;  %v1202_v38 = vld [vmem:[%s2400_s6 + $0x20] sm:$0xff] }
  0x21   : > { %1831 = vmatpush3.bf16.msra.mxu0 %v1830_v44  ;;  %v669_v44 = vld [vmem:[%s2403_s9 + $0x10] sm:$0xff] }
  0x22   : > { %1833 = vmatprep.subr.bf16.mxu0 %v1832_v45  ;;  %v670_v45 = vld [vmem:[%s2403_s9 + $0x18] sm:$0xff] }
  0x23   : > { %v1858_v46 = vpack.c.bf16 %v670_v45, %v669_v44  ;;  %v1348_v45 = vld [vmem:[%s2401_s7 + $0x28] sm:$0xff] }
  0x25   : > { %1835 = vmatpush3.bf16.msra.mxu0 %v1834_v48  ;;  %v976_v48 = vld [vmem:[%s2397_s3] sm:$0xf] }
  0x28   : > { %473 = vmatmul.mubr.f32.vlgmr.msra.gmra.mrb[0].mxu0 %v2093_v49 }
  0x29   : > { %477 = vmatprep.mubr.f32.mxu0 %v2096_v50 }
  0x2c   : > { %478 = vmatmul.mubr.f32.gmra.mrb[2].mxu0 %v2101_v51 }
  0x2d   : > { %482 = vmatprep.mubr.f32.mxu0 %v2104_v52 }
  0x30   : > { %483 = vmatmul.mubr.f32.gmra.mrb[4].mxu0 %v2109_v53 }
  0x31   : > { %487 = vmatprep.mubr.f32.mxu0 %v2112_v54 }
  0x34   : > { %488 = vmatmul.mubr.f32.gmra.mrb[6].mxu0 %v2117_v55 }
  0x35   : > { %492 = vmatprep.mubr.f32.mxu0 %v2120_v56 }
  0x38   : > { %493 = vmatmul.mubr.f32.gmra.mrb[8].mxu0 %v2125_v57 }
  0x39   : > { %497 = vmatprep.mubr.f32.mxu0 %v2128_v58 }
  0x3c   : > { %498 = vmatmul.mubr.f32.gmra.mrb[10].mxu0 %v2133_v59 }
  0x3d   : > { %502 = vmatprep.mubr.f32.mxu0 %v2136_v60 }
  0x40   : > { %503 = vmatmul.mubr.f32.gmra.mrb[12].mxu0 %v2141_v61 }
  0x41   : > { %507 = vmatprep.mubr.f32.mxu0 %v2144_v62 }
  0x44   : > { %508 = vmatmul.mubr.f32.gmra.mrb[14].mxu0 %v2149_v63 }
  0x45   : > { %1294 = vmatprep.mubr.f32.mxu0 %v1917_v1 }
  0xfb   : > { %v1676_v2 = vpop.f32.mrb[0].mxu0 }
  0xfc   : > { %v1677_v3 = vpop.f32.mrb[1].mxu0 }
  0xfd   : > { %v1678_v4 = vadd.f32 %v1677_v3, %v1676_v2  ;;  %v741_v2 = vld [vmem:[%s2396_s2] sm:$0xf] }
  0xff   : > { %v1679_v5 = vpop.f32.mrb[2].mxu0 }
 0x100   : > { %v1680_v6 = vpop.f32.mrb[3].mxu0 }
 0x101   : > { %v1681_v7 = vadd.f32 %v1680_v6, %v1679_v5  ;;  %v1612_v5 = vld [vmem:[%s2396_s2 + $0x8] sm:$0xf] }
 0x103   : > { %v1682_v8 = vpop.f32.mrb[4].mxu0  ;;  %v1837_v9 = vpack.c.bf16 %v1681_v7, %v1678_v4 }
 0x104   : > { %v1683_v10 = vpop.f32.mrb[5].mxu0 }
 0x105   : > { %v1684_v11 = vadd.f32 %v1683_v10, %v1682_v8  ;;  %1838 = vmatpush3.bf16.msra.mxu1 %v1837_v9  ;;  %v983_v10 = vld [vmem:[%s2398_s4] sm:$0xff] }
 0x106   : > { %1839 = vmatprep.subr.bf16.mxu1 %v1915_v0 }
 0x107   : > { %v1685_v12 = vpop.f32.mrb[6].mxu0 }
 0x108   : > { %v1686_v13 = vpop.f32.mrb[7].mxu0 }
 0x109   : > { %v1687_v14 = vadd.f32 %v1686_v13, %v1685_v12 }
 0x10b   : > { %v1840_v15 = vpack.c.bf16 %v1687_v14, %v1684_v11  ;;  %v1688_v16 = vpop.f32.mrb[8].mxu0 }
 0x10c   : > { %v1689_v17 = vpop.f32.mrb[9].mxu0 }
 0x10d   : > { %v1690_v18 = vadd.f32 %v1689_v17, %v1688_v16  ;;  %1841 = vmatpush3.bf16.msra.mxu1 %v1840_v15 }
 0x10e   : > { %1842 = vmatprep.subr.bf16.mxu1 %v1915_v0 }
 0x10f   : > { %v1691_v19 = vpop.f32.mrb[10].mxu0 }
 0x110   : > { %v1692_v20 = vpop.f32.mrb[11].mxu0 }
 0x111   : > { %v1693_v21 = vadd.f32 %v1692_v20, %v1691_v19  ;;  %v984_v19 = vld [vmem:[%s2398_s4 + $0x8] sm:$0xff]  ;;  %v985_v20 = vld [vmem:[%s2398_s4 + $0x10] sm:$0xff] }
 0x113   : > { %v1843_v22 = vpack.c.bf16 %v1693_v21, %v1690_v18  ;;  %v1694_v23 = vpop.f32.mrb[12].mxu0  ;;  %v986_v21 = vld [vmem:[%s2398_s4 + $0x18] sm:$0xff] }
 0x114   : > { %v1695_v24 = vpop.f32.mrb[13].mxu0 }
 0x115   : > { %v1696_v26 = vadd.f32 %v1695_v24, %v1694_v23  ;;  %1844 = vmatpush3.bf16.msra.mxu1 %v1843_v22  ;;  %v987_v22 = vld [vmem:[%s2398_s4 + $0x20] sm:$0xff]  ;;  %v988_v23 = vld [vmem:[%s2398_s4 + $0x28] sm:$0xff]  ;;  %v989_v24 = vld [vmem:[%s2398_s4 + $0x30] sm:$0xff] }
 0x116   : > { %1845 = vmatprep.subr.bf16.mxu1 %v1915_v0 }
 0x117   : > { %v1697_v27 = vpop.f32.mrb[14].mxu0 }
 0x118   : > { %v1698_v28 = vpop.f32.mrb[15].mxu0 }
 0x119   : > { %v1699_v29 = vadd.f32 %v1698_v28, %v1697_v27  ;;  %v1199_v27 = vld [vmem:[%s2400_s6 + $0x8] sm:$0xff]  ;;  %v1201_v28 = vld [vmem:[%s2400_s6 + $0x18] sm:$0xff] }
 0x11a   : > { %v1860_v30 = vpack.c.bf16 %v1201_v28, %v1199_v27 }
 0x11b   : > { %v1846_v32 = vpack.c.bf16 %v1699_v29, %v1696_v26  ;;  %v990_v26 = vld [vmem:[%s2398_s4 + $0x38] sm:$0xff]  ;;  %v1198_v29 = vld [vmem:[%s2400_s6] sm:$0xff] }
 0x11c   : > { %1861 = vmatprep.subr.bf16.mxu0 %v1860_v30 }
 0x11d   : > { %1847 = vmatpush3.bf16.msra.mxu1 %v1846_v32  ;;  %v1203_v32 = vld [vmem:[%s2400_s6 + $0x28] sm:$0xff] }
 0x11e   : > { %1848 = vmatprep.subr.bf16.mxu1 %v1915_v0 }
 0x120   : > { %1751 = vmatmul.mubr.msk.f32.vlgmr.msra.gmra.mrb[0].mxu1 %vm514_vm1, %v513_v33  ;;  %v1205_v33 = vld [vmem:[%s2400_s6 + $0x38] sm:$0xff] }
 0x121   : > { %1850 = vmatpush3.bf16.msra.mxu1 %v1849_v34  ;;  %1761 = vmatprep.mubr.msk.f32.mxu1 %vm1916_vm0, %v1917_v1  ;;  %v1862_v34 = vpack.c.bf16 %v1200_v31, %v1198_v29  ;;  %v1864_v35 = vpack.c.bf16 %v1205_v33, %v1203_v32 }
 0x122   : > { %1851 = vmatprep.subr.bf16.mxu1 %v1915_v0 }
 0x123   : > { %1863 = vmatpush1.bf16.msra.mxu0 %v1862_v34 }
 0x124   : > { %1865 = vmatprep.subr.bf16.mxu0 %v1864_v35 }
 0x125   : > { %1853 = vmatpush3.bf16.msra.mxu1 %v1852_v37  ;;  %v1346_v37 = vld [vmem:[%s2401_s7 + $0x18] sm:$0xff] }
 0x126   : > { %1854 = vmatprep.subr.bf16.mxu1 %v1915_v0  ;;  %v1868_v39 = vpack.c.bf16 %v1346_v37, %v1344_v36 }
 0x1f3   : > { %v584_v40 = vpop.f32.mrb[0].mxu1 }
 0x1f4   : > { %v588_v42 = vmax.f32 %v584_v40, 0.0  ;;  %v1752_v43 = vpop.f32.mrb[1].mxu1  ;;  %v1204_v40 = vld [vmem:[%s2400_s6 + $0x30] sm:$0xff] }
 0x1f5   : > { %v1866_v43 = vpack.c.bf16 %v1204_v40, %v1202_v38 }
 0x1f6   : > { %1762 = vmatmul.mubr.msk.f32.vlgmr.msra.gmra.mrb[2].mxu1 %vm593_vm2, %v588_v42 }
 0x1f7   : > { %1856 = vmatpush3.bf16.msra.mxu1 %v1855_v41  ;;  %1772 = vmatprep.mubr.msk.f32.mxu1 %vm1916_vm0, %v1917_v1  ;;  %v1343_v41 = vld [vmem:[%s2401_s7] sm:$0xff] }
 0x1f8   : > { %1857 = vmatprep.subr.bf16.mxu1 %v1915_v0  ;;  %v1918_v0 = vmov 0   ;;  %1867 = vmatpush1.bf16.msra.mxu0 %v1866_v43 }
 0x1f9   : > { %1888 = vset.pattern.permute.xlu0 %v1918_v0  ;;  %v1349_v0 = vld [vmem:[%s2401_s7 + $0x30] sm:$0xff] }
 0x1fa   : > { %979 = vperm.xlu0 %1888, %v976_v48  }
 0x1fb   : > { %1859 = vmatpush3.bf16.msra.mxu1 %v1858_v46  ;;  %v1350_v46 = vld [vmem:[%s2401_s7 + $0x38] sm:$0xff] }
 0x1fc   : > { %1775 = vmatprep.subr.mxu1 %v1917_v1  ;;  %v1872_v48 = vpack.c.bf16 %v1350_v46, %v1348_v45 }
 0x1fe   : > { %1773 = vmatmul.mubr.msk.f32.vlgmr.msra.gmra.mrb[4].mxu1 %vm593_vm2, %v588_v42 }
 0x1ff   : > { %1776 = vmatpush3.msk.msra.mxu1 %vm748_vm3, %v588_v42  ;;  %1777 = vmatprep.mubr.msk.f32.mxu1 %vm1916_vm0, %v1917_v1  ;;  %v1345_v42 = vld [vmem:[%s2401_s7 + $0x10] sm:$0xff] }
 0x200   : > { %1780 = vmatprep.subr.mxu1 %v1917_v1  ;;  %v1870_v44 = vpack.c.bf16 %v1345_v42, %v1343_v41 }
 0x202   : > { %1778 = vmatmul.mubr.msk.f32.vlgmr.msra.gmra.mrb[6].mxu1 %vm744_vm4, %v1607_v47  ;;  %v1347_v47 = vld [vmem:[%s2401_s7 + $0x20] sm:$0xff] }
 0x203   : > { %1782 = vmatprep.mubr.msk.f32.mxu1 %vm1916_vm0, %v1917_v1 }
 0x279   : > { %v980_v15 = vpop.permute.xlu0 %979 }
 0x2c9   : > { %v663_v3 = vpop.f32.mrb[2].mxu1 }
 0x2ca   : > { %v1763_v4 = vpop.f32.mrb[3].mxu1  ;;  %1781 = vmatpush3.msk.msra.mxu1 %vm748_vm3, %v663_v3 }
 0x2cb   : > { %1783 = vmatmul.mubr.msk.f32.vlgmr.msra.gmra.mrb[8].mxu1 %vm744_vm4, %v741_v2  ;;  %1785 = vmatprep.subr.mxu1 %v1917_v1  ;;  %v1874_v2 = vpack.c.bf16 %v1349_v0, %v1347_v47 }
 0x2cc   : > { %1787 = vmatprep.mubr.msk.f32.mxu1 %vm1916_vm0, %v1917_v1 }
 0x2d1   : > { %v737_v6 = vpop.f32.mrb[4].mxu1 }
 0x2d2   : > { %v1774_v7 = vpop.f32.mrb[5].mxu1  ;;  %1786 = vmatpush3.msk.msra.mxu1 %vm748_vm3, %v737_v6 }
 0x2d3   : > { %1788 = vmatmul.mubr.msk.f32.vlgmr.msra.gmra.mrb[10].mxu1 %vm744_vm4, %v1612_v5 }
 0x2d4   : > { %1792 = vmatprep.mubr.msk.f32.mxu1 %vm744_vm4, %v983_v10 }
 0x2d5   : > { %v817_v8 = vpop.f32.mrb[6].mxu1 }
 0x2d6   : > { %v1779_v9 = vpop.f32.mrb[7].mxu1 }
 0x39e   : > { %v893_v11 = vpop.f32.mrb[8].mxu1 }
 0x39f   : > { %v894_v12 = vadd.f32 %v893_v11, %v817_v8  ;;  %v1784_v13 = vpop.f32.mrb[9].mxu1 }
 0x3a6   : > { %v971_v14 = vpop.f32.mrb[10].mxu1 }
 0x3a7   : > { %v975_v16 = vadd.f32 %v971_v14, %v894_v12  ;;  %v1789_v17 = vpop.f32.mrb[11].mxu1 }
 0x3a9   : > { %v982_v18 = vadd.f32 %v980_v15, %v975_v16 }
 0x3ab   : > { %1790 = vmatprep.subr.msk.mxu1 %vm748_vm3, %v982_v18 }
 0x3ac   : > { %1791 = vmatpush3.msk.msra.mxu1 %vm748_vm3, %v982_v18 }
 0x3ad   : > { %1793 = vmatmul.mubr.msk.f32.vlgmr.msra.gmra.mrb[12].mxu1 %vm744_vm4, %v984_v19  ;;  %1869 = vmatprep.subr.bf16.mxu1 %v1868_v39 }
 0x3ae   : > { %1795 = vmatprep.mubr.msk.f32.mxu1 %vm744_vm4, %v985_v20  ;;  %1871 = vmatpush1.bf16.msra.mxu1 %v1870_v44 }
 0x3af   : > { %1873 = vmatprep.subr.bf16.mxu1 %v1872_v48 }
 0x3b1   : > { %1796 = vmatmul.mubr.msk.f32.gmra.mrb[14].mxu1 %vm744_vm4, %v986_v21 }
 0x3b2   : > { %1798 = vmatprep.mubr.msk.f32.mxu1 %vm744_vm4, %v987_v22  ;;  %1875 = vmatpush1.bf16.msra.mxu1 %v1874_v2 }
 0x3b5   : > { %1799 = vmatmul.mubr.msk.f32.gmra.mrb[16].mxu1 %vm744_vm4, %v988_v23 }
 0x3b6   : > { %1801 = vmatprep.mubr.msk.f32.mxu1 %vm744_vm4, %v989_v24 }
 0x3b9   : > { %1802 = vmatmul.mubr.msk.f32.gmra.mrb[18].mxu1 %vm744_vm4, %v990_v26 }
 0x3ba   : > { %1415 = vmatprep.mubr.f32.mxu1 %v1917_v1 }
 0x480   : > { %v1794_v3 = vpop.f32.mrb[12].mxu1 }
 0x481   : > { %v1084_v4 = vpop.f32.mrb[13].mxu1  ;;  %v1124_v8 = vsel %vm593_vm2, %v1794_v3, -inf }
 0x482   : > { %v1123_v11 = vsel %vm593_vm2, %v1084_v4, -inf }
 0x484   : > { %v1797_v5 = vpop.f32.mrb[14].mxu1 }
 0x485   : > { %v1094_v6 = vpop.f32.mrb[15].mxu1  ;;  %v1126_v16 = vsel %vm593_vm2, %v1797_v5, -inf }
 0x486   : > { %v1125_v20 = vsel %vm593_vm2, %v1094_v6, -inf }
 0x488   : > { %v1800_v7 = vpop.f32.mrb[16].mxu1 }
 0x489   : > { %v1129_v9 = vsel %vm593_vm2, %v1800_v7, -inf  ;;  %v1104_v10 = vpop.f32.mrb[17].mxu1 }
 0x48a   : > { %v1130_v12 = vmax.f32 %v1124_v8, %v1129_v9  ;;  %v1127_v13 = vsel %vm593_vm2, %v1104_v10, -inf }
 0x48b   : > { %v1128_v14 = vmax.f32 %v1123_v11, %v1127_v13 }
 0x48c   : > { %v1803_v15 = vpop.f32.mrb[18].mxu1 }
 0x48d   : > { %v1135_v17 = vmax.f32 %v1128_v14, %v1130_v12  ;;  %v1133_v18 = vsel %vm593_vm2, %v1803_v15, -inf  ;;  %v1114_v19 = vpop.f32.mrb[19].mxu1 }
 0x48e   : > { %v1134_v21 = vmax.f32 %v1126_v16, %v1133_v18  ;;  %v1131_v22 = vsel %vm593_vm2, %v1114_v19, -inf }
 0x48f   : > { %v1132_v23 = vmax.f32 %v1125_v20, %v1131_v22 }
 0x491   : > { %v1136_v24 = vmax.f32 %v1132_v23, %v1134_v21 }
 0x493   : > { %v1137_v26 = vmax.f32 %v1135_v17, %v1136_v24 }
 0x495   : > { %v1138_v27 = vrot.slane %v1137_v26, 4 }
 0x497   : > { %v1139_v28 = vmax.f32 %v1137_v26, %v1138_v27 }
 0x499   : > { %v1140_v29 = vrot.slane %v1139_v28, 2 }
 0x49b   : > { %v1141_v30 = vmax.f32 %v1139_v28, %v1140_v29 }
 0x49d   : > { %v1142_v31 = vrot.slane %v1141_v30, 1 }
 0x49f   : > { %v1143_v32 = vmax.f32 %v1141_v30, %v1142_v31 }
 0x4a1   : > { %v1144_v33 = vsub.f32 %v1084_v4, %v1143_v32  ;;  %v1145_v34 = vsub.f32 %v1794_v3, %v1143_v32  ;;  %v1146_v35 = vsub.f32 %v1094_v6, %v1143_v32  ;;  %v1147_v36 = vsub.f32 %v1797_v5, %v1143_v32 }
 0x4a2   : > { %v1148_v37 = vsub.f32 %v1104_v10, %v1143_v32  ;;  %v1149_v38 = vsub.f32 %v1800_v7, %v1143_v32  ;;  %v1150_v39 = vsub.f32 %v1114_v19, %v1143_v32  ;;  %v1151_v40 = vsub.f32 %v1803_v15, %v1143_v32 }
 0x4a3   : > { %v1152_v41 = vmul.f32 1.442695, %v1144_v33  ;;  %v1154_v42 = vmul.f32 1.442695, %v1145_v34  ;;  %v1156_v43 = vmul.f32 1.442695, %v1146_v35 }
 0x4a4   : > { %v1158_v44 = vmul.f32 1.442695, %v1147_v36  ;;  %v1160_v45 = vmul.f32 1.442695, %v1148_v37  ;;  %v1162_v46 = vmul.f32 1.442695, %v1149_v38 }
 0x4a5   : > { %1889 = vpow2.f32 %v1152_v41  ;;  %v1164_v47 = vmul.f32 1.442695, %v1150_v39  ;;  %v1166_v48 = vmul.f32 1.442695, %v1151_v40 }
 0x4a6   : > { %1891 = vpow2.f32 %v1154_v42 }
 0x4a7   : > { %1893 = vpow2.f32 %v1156_v43 }
 0x4a8   : > { %1895 = vpow2.f32 %v1158_v44 }
 0x4a9   : > { %1897 = vpow2.f32 %v1160_v45 }
 0x4aa   : > { %1899 = vpow2.f32 %v1162_v46 }
 0x4ab   : > { %1901 = vpow2.f32 %v1164_v47 }
 0x4ac   : > { %1903 = vpow2.f32 %v1166_v48 }
 0x4af   : > { %v1890_v0 = vpop.eup %1889 }
 0x4b0   : > { %v1892_v2 = vpop.eup %1891  ;;  %v1168_v3 = vsel %vm593_vm2, %v1890_v0, 0.0 }
 0x4b1   : > { %v1894_v4 = vpop.eup %1893  ;;  %v1169_v5 = vsel %vm593_vm2, %v1892_v2, 0.0 }
 0x4b2   : > { %v1896_v6 = vpop.eup %1895  ;;  %v1170_v7 = vadd.f32 %v1169_v5, %v1168_v3  ;;  %v1171_v8 = vsel %vm593_vm2, %v1894_v4, 0.0 }
 0x4b3   : > { %v1898_v9 = vpop.eup %1897  ;;  %v1173_v11 = vsel %vm593_vm2, %v1896_v6, 0.0 }
 0x4b4   : > { %v1172_v10 = vadd.f32 %v1171_v8, %v1170_v7  ;;  %v1900_v12 = vpop.eup %1899  ;;  %v1175_v14 = vsel %vm593_vm2, %v1898_v9, 0.0 }
 0x4b5   : > { %v1902_v15 = vpop.eup %1901  ;;  %v1177_v17 = vsel %vm593_vm2, %v1900_v12, 0.0 }
 0x4b6   : > { %v1174_v13 = vadd.f32 %v1173_v11, %v1172_v10  ;;  %v1904_v18 = vpop.eup %1903  ;;  %v1179_v20 = vsel %vm593_vm2, %v1902_v15, 0.0 }
 0x4b7   : > { %v1181_v22 = vsel %vm593_vm2, %v1904_v18, 0.0 }
 0x4b8   : > { %v1176_v16 = vadd.f32 %v1175_v14, %v1174_v13 }
 0x4ba   : > { %v1178_v19 = vadd.f32 %v1177_v17, %v1176_v16 }
 0x4bc   : > { %v1180_v21 = vadd.f32 %v1179_v20, %v1178_v19 }
 0x4be   : > { %v1182_v23 = vadd.f32 %v1181_v22, %v1180_v21 }
 0x4c0   : > { %v1183_v24 = vrot.slane %v1182_v23, 4 }
 0x4c2   : > { %v1184_v26 = vadd.f32 %v1183_v24, %v1182_v23 }
 0x4c4   : > { %v1185_v27 = vrot.slane %v1184_v26, 2 }
 0x4c6   : > { %v1186_v28 = vadd.f32 %v1185_v27, %v1184_v26 }
 0x4c8   : > { %v1187_v29 = vrot.slane %v1186_v28, 1 }
 0x4ca   : > { %v1188_v30 = vadd.f32 %v1187_v29, %v1186_v28 }
 0x4cc   : > { %1905 = vrcp.f32 %v1188_v30 }
 0x4d6   : > { %v1906_v31 = vpop.eup %1905 }
 0x4d7   : > { %v1190_v32 = vmul.f32 %v1906_v31, %v1890_v0  ;;  %v1191_v33 = vmul.f32 %v1906_v31, %v1892_v2  ;;  %v1192_v34 = vmul.f32 %v1906_v31, %v1894_v4  ;;  %v1193_v35 = vmul.f32 %v1906_v31, %v1896_v6 }
 0x4d8   : > { %v1194_v36 = vmul.f32 %v1906_v31, %v1898_v9  ;;  %v1195_v37 = vmul.f32 %v1906_v31, %v1900_v12  ;;  %v1196_v38 = vmul.f32 %v1906_v31, %v1902_v15  ;;  %v1197_v39 = vmul.f32 %v1906_v31, %v1904_v18 }
 0x4d9   : > { %1624 = vmatmul.mubr.msk.f32.vlgmr.msra.gmra.mrb[16].mxu0 %vm593_vm2, %v1190_v32  ;;  %1632 = vmatmul.mubr.msk.f32.vlgmr.msra.gmra.mrb[20].mxu1 %vm593_vm2, %v1190_v32 }
 0x4da   : > { %1300 = vmatprep.mubr.f32.mxu0 %v1917_v1  ;;  %1421 = vmatprep.mubr.f32.mxu1 %v1917_v1 }
 0x4dd   : > { %1625 = vmatmul.mubr.msk.f32.gmra.mrb[18].mxu0 %vm593_vm2, %v1191_v33  ;;  %1633 = vmatmul.mubr.msk.f32.gmra.mrb[22].mxu1 %vm593_vm2, %v1191_v33 }
 0x4de   : > { %1306 = vmatprep.mubr.f32.mxu0 %v1917_v1  ;;  %1427 = vmatprep.mubr.f32.mxu1 %v1917_v1 }
 0x4e1   : > { %1626 = vmatmul.mubr.msk.f32.gmra.mrb[20].mxu0 %vm593_vm2, %v1192_v34  ;;  %1634 = vmatmul.mubr.msk.f32.gmra.mrb[24].mxu1 %vm593_vm2, %v1192_v34 }
 0x4e2   : > { %1312 = vmatprep.mubr.f32.mxu0 %v1917_v1  ;;  %1433 = vmatprep.mubr.f32.mxu1 %v1917_v1 }
 0x4e5   : > { %1627 = vmatmul.mubr.msk.f32.gmra.mrb[22].mxu0 %vm593_vm2, %v1193_v35  ;;  %1635 = vmatmul.mubr.msk.f32.gmra.mrb[26].mxu1 %vm593_vm2, %v1193_v35 }
 0x4e6   : > { %1318 = vmatprep.mubr.f32.mxu0 %v1917_v1  ;;  %1439 = vmatprep.mubr.f32.mxu1 %v1917_v1 }
 0x4e9   : > { %1628 = vmatmul.mubr.msk.f32.gmra.mrb[24].mxu0 %vm593_vm2, %v1194_v36  ;;  %1636 = vmatmul.mubr.msk.f32.gmra.mrb[28].mxu1 %vm593_vm2, %v1194_v36 }
 0x4ea   : > { %1324 = vmatprep.mubr.f32.mxu0 %v1917_v1  ;;  %1445 = vmatprep.mubr.f32.mxu1 %v1917_v1 }
 0x4ed   : > { %1629 = vmatmul.mubr.msk.f32.gmra.mrb[26].mxu0 %vm593_vm2, %v1195_v37  ;;  %1637 = vmatmul.mubr.msk.f32.gmra.mrb[30].mxu1 %vm593_vm2, %v1195_v37 }
 0x4ee   : > { %1330 = vmatprep.mubr.f32.mxu0 %v1917_v1  ;;  %1451 = vmatprep.mubr.f32.mxu1 %v1917_v1 }
 0x4f1   : > { %1630 = vmatmul.mubr.msk.f32.gmra.mrb[28].mxu0 %vm593_vm2, %v1196_v38  ;;  %1638 = vmatmul.mubr.msk.f32.gmra.mrb[32].mxu1 %vm593_vm2, %v1196_v38 }
 0x4f2   : > { %1336 = vmatprep.mubr.f32.mxu0 %v1917_v1  ;;  %1457 = vmatprep.mubr.f32.mxu1 %v1917_v1 }
 0x4f5   : > { %1631 = vmatmul.mubr.msk.f32.gmra.mrb[30].mxu0 %vm593_vm2, %v1197_v39  ;;  %1639 = vmatmul.mubr.msk.f32.gmra.mrb[34].mxu1 %vm593_vm2, %v1197_v39 }
 0x5ac   : > { %v1296_v40 = vpop.f32.mrb[16].mxu0  ;;  %v1417_v41 = vpop.f32.mrb[20].mxu1 }
 0x5ad   : > { %v1464_v42 = vmul.f32 %v1417_v41, %v1296_v40  ;;  %v1298_v43 = vpop.f32.mrb[17].mxu0  ;;  %v1419_v44 = vpop.f32.mrb[21].mxu1 }
 0x5ae   : > { %v1465_v45 = vmul.f32 %v1419_v44, %v1298_v43 }
 0x5b0   : > { %v1302_v46 = vpop.f32.mrb[18].mxu0  ;;  %v1423_v47 = vpop.f32.mrb[22].mxu1 }
 0x5b1   : > { %v1466_v48 = vmul.f32 %v1423_v47, %v1302_v46  ;;  %v1304_v0 = vpop.f32.mrb[19].mxu0  ;;  %v1425_v2 = vpop.f32.mrb[23].mxu1 }
 0x5b2   : > { %v1467_v3 = vmul.f32 %v1425_v2, %v1304_v0 }
 0x5b3   : > { %v1480_v4 = vadd.f32 %v1466_v48, %v1464_v42 }
 0x5b4   : > { %v1493_v5 = vadd.f32 %v1467_v3, %v1465_v45  ;;  %v1308_v6 = vpop.f32.mrb[20].mxu0  ;;  %v1429_v1 = vpop.f32.mrb[24].mxu1 }
 0x5b5   : > { %v1468_v7 = vmul.f32 %v1429_v1, %v1308_v6  ;;  %v1310_v8 = vpop.f32.mrb[21].mxu0  ;;  %v1431_v9 = vpop.f32.mrb[25].mxu1 }
 0x5b6   : > { %v1469_v10 = vmul.f32 %v1431_v9, %v1310_v8 }
 0x5b7   : > { %v1481_v11 = vadd.f32 %v1480_v4, %v1468_v7 }
 0x5b8   : > { %v1494_v12 = vadd.f32 %v1493_v5, %v1469_v10  ;;  %v1314_v13 = vpop.f32.mrb[22].mxu0  ;;  %v1435_v14 = vpop.f32.mrb[26].mxu1 }
 0x5b9   : > { %v1470_v15 = vmul.f32 %v1435_v14, %v1314_v13  ;;  %v1316_v16 = vpop.f32.mrb[23].mxu0  ;;  %v1437_v17 = vpop.f32.mrb[27].mxu1 }
 0x5ba   : > { %v1471_v18 = vmul.f32 %v1437_v17, %v1316_v16 }
 0x5bb   : > { %v1482_v19 = vadd.f32 %v1481_v11, %v1470_v15 }
 0x5bc   : > { %v1495_v20 = vadd.f32 %v1494_v12, %v1471_v18  ;;  %v1320_v21 = vpop.f32.mrb[24].mxu0  ;;  %v1441_v22 = vpop.f32.mrb[28].mxu1 }
 0x5bd   : > { %v1472_v23 = vmul.f32 %v1441_v22, %v1320_v21  ;;  %v1322_v24 = vpop.f32.mrb[25].mxu0  ;;  %v1443_v26 = vpop.f32.mrb[29].mxu1 }
 0x5be   : > { %v1473_v27 = vmul.f32 %v1443_v26, %v1322_v24 }
 0x5bf   : > { %v1483_v28 = vadd.f32 %v1482_v19, %v1472_v23 }
 0x5c0   : > { %v1496_v29 = vadd.f32 %v1495_v20, %v1473_v27  ;;  %v1326_v30 = vpop.f32.mrb[26].mxu0  ;;  %v1447_v31 = vpop.f32.mrb[30].mxu1 }
 0x5c1   : > { %v1474_v32 = vmul.f32 %v1447_v31, %v1326_v30  ;;  %v1328_v33 = vpop.f32.mrb[27].mxu0  ;;  %v1449_v34 = vpop.f32.mrb[31].mxu1 }
 0x5c2   : > { %v1475_v35 = vmul.f32 %v1449_v34, %v1328_v33 }
 0x5c3   : > { %v1484_v36 = vadd.f32 %v1483_v28, %v1474_v32 }
 0x5c4   : > { %v1497_v37 = vadd.f32 %v1496_v29, %v1475_v35  ;;  %v1332_v38 = vpop.f32.mrb[28].mxu0  ;;  %v1453_v39 = vpop.f32.mrb[32].mxu1 }
 0x5c5   : > { %v1476_v40 = vmul.f32 %v1453_v39, %v1332_v38  ;;  %v1334_v41 = vpop.f32.mrb[29].mxu0  ;;  %v1455_v42 = vpop.f32.mrb[33].mxu1 }
 0x5c6   : > { %v1477_v43 = vmul.f32 %v1455_v42, %v1334_v41 }
 0x5c7   : > { %v1485_v44 = vadd.f32 %v1484_v36, %v1476_v40 }
 0x5c8   : > { %v1498_v45 = vadd.f32 %v1497_v37, %v1477_v43  ;;  %v1338_v46 = vpop.f32.mrb[30].mxu0  ;;  %v1459_v47 = vpop.f32.mrb[34].mxu1 }
 0x5c9   : > { %v1478_v48 = vmul.f32 %v1459_v47, %v1338_v46  ;;  %v1340_v0 = vpop.f32.mrb[31].mxu0  ;;  %v1461_v2 = vpop.f32.mrb[35].mxu1 }
 0x5ca   : > { %v1479_v3 = vmul.f32 %v1461_v2, %v1340_v0 }
 0x5cb   : > { %v1486_v4 = vadd.f32 %v1485_v44, %v1478_v48 }
 0x5cc   : > { %v1499_v5 = vadd.f32 %v1498_v45, %v1479_v3 }
 0x5cd   : > { %v1487_v6 = vrot.slane %v1486_v4, 4 }
 0x5ce   : > { %v1500_v1 = vrot.slane %v1499_v5, 4 }
 0x5cf   : > { %v1488_v7 = vadd.f32 %v1487_v6, %v1486_v4 }
 0x5d0   : > { %v1501_v8 = vadd.f32 %v1500_v1, %v1499_v5 }
 0x5d1   : > { %v1489_v9 = vrot.slane %v1488_v7, 2 }
 0x5d2   : > { %v1502_v10 = vrot.slane %v1501_v8, 2 }
 0x5d3   : > { %v1490_v11 = vadd.f32 %v1489_v9, %v1488_v7 }
 0x5d4   : > { %v1503_v12 = vadd.f32 %v1502_v10, %v1501_v8 }
 0x5d5   : > { %v1491_v13 = vrot.slane %v1490_v11, 1 }
 0x5d6   : > { %v1504_v14 = vrot.slane %v1503_v12, 1 }
 0x5d7   : > { %v1492_v15 = vadd.f32 %v1491_v13, %v1490_v11 }
 0x5d8   : > { %v1505_v16 = vadd.f32 %v1504_v14, %v1503_v12 }
 0x5d9   : > { %v1506_v17 = vmul.f32 0.015625, %v1492_v15 }
 0x5da   : > { %v1507_v18 = vmul.f32 0.015625, %v1505_v16 }
 0x5db   : > { %v1508_v19 = vmul.f32 %v1506_v17, %v2093_v49  ;;  %v1510_v20 = vmul.f32 %v1506_v17, %v2101_v51  ;;  %v1512_v21 = vmul.f32 %v1506_v17, %v2109_v53  ;;  %v1514_v22 = vmul.f32 %v1506_v17, %v2117_v55 }
 0x5dc   : > { %v1516_v23 = vmul.f32 %v1506_v17, %v2125_v57  ;;  %v1518_v24 = vmul.f32 %v1506_v17, %v2133_v59  ;;  %v1520_v26 = vmul.f32 %v1506_v17, %v2141_v61  ;;  %v1522_v27 = vmul.f32 %v1506_v17, %v2149_v63 }
 0x5dd   : > { %1524 = vst [vmem:[%s2357_s23] sm:$0xff] %v1508_v19  ;;  %1526 = vst [vmem:[%s2357_s23 + $0x10] sm:$0xff] %v1510_v20  ;;  %v1509_v49 = vmul.f32 %v1507_v18, %v2047_v25  ;;  %v1511_v51 = vmul.f32 %v1507_v18, %v2096_v50  ;;  %v1513_v53 = vmul.f32 %v1507_v18, %v2104_v52 }
 0x5de   : > { %1528 = vst [vmem:[%s2357_s23 + $0x20] sm:$0xff] %v1512_v21  ;;  %1530 = vst [vmem:[%s2357_s23 + $0x30] sm:$0xff] %v1514_v22  ;;  %v1515_v55 = vmul.f32 %v1507_v18, %v2112_v54  ;;  %v1517_v57 = vmul.f32 %v1507_v18, %v2120_v56  ;;  %v1519_v59 = vmul.f32 %v1507_v18, %v2128_v58 }
 0x5df   : > { %1532 = vst [vmem:[%s2357_s23 + $0x40] sm:$0xff] %v1516_v23  ;;  %1534 = vst [vmem:[%s2357_s23 + $0x50] sm:$0xff] %v1518_v24  ;;  %v1521_v25 = vmul.f32 %v1507_v18, %v2136_v60  ;;  %v1523_v61 = vmul.f32 %v1507_v18, %v2144_v62 }
 0x5e0   : > { %1536 = vst [vmem:[%s2357_s23 + $0x60] sm:$0xff] %v1520_v26  ;;  %1538 = vst [vmem:[%s2357_s23 + $0x70] sm:$0xff] %v1522_v27 }
 0x5e1   : > { %1525 = vst [vmem:[%s2357_s23 + $0x8] sm:$0xff] %v1509_v49  ;;  %1527 = vst [vmem:[%s2357_s23 + $0x18] sm:$0xff] %v1511_v51 }
 0x5e2   : > { %1529 = vst [vmem:[%s2357_s23 + $0x28] sm:$0xff] %v1513_v53  ;;  %1531 = vst [vmem:[%s2357_s23 + $0x38] sm:$0xff] %v1515_v55 }
 0x5e3   : > { %1533 = vst [vmem:[%s2357_s23 + $0x48] sm:$0xff] %v1517_v57  ;;  %1535 = vst [vmem:[%s2357_s23 + $0x58] sm:$0xff] %v1519_v59 }
 0x5e4   : > { %1537 = vst [vmem:[%s2357_s23 + $0x68] sm:$0xff] %v1521_v25  ;;  %1539 = vst [vmem:[%s2357_s23 + $0x78] sm:$0xff] %v1523_v61 }
 0x5e5 PF: > { %s20_s13 = sadd.s32 1, %s1913_s13  }
 0x5e6   : > { %p17_p4 = scmp.ge.s32.totalorder %s20_s13, 4  }
 0x5e8   :  { %19 = sbr.rel (!%p17_p4) target bundleno = 1 (0x1), region = 92 }

</bundles_post_ra>
